<compile_context>
chip_gen: v7x
topology: tpu7x:2x2x1
jax: 0.10.0
libtpu: 0.0.40
codegen_flags: <defaults>
</compile_context>

<pallas_src>
import functools
import math

import jax
import jax.numpy as jnp
from jax.experimental import pallas as pl
from jax.experimental.pallas import tpu as pltpu

_EPS = 1e-5
_CP = 8          # channel padding: every conv runs with 8-in / 8-out channels


# --------------------------------------------------------------------------------------
# pltpu.roll convention probe (tiny one-off kernel).  We need shifted[:, j] = x[:, j + d];
# depending on the rotate convention that is roll(x, -d) (numpy) or roll(x, +d).
# --------------------------------------------------------------------------------------
_ROLL_IS_NUMPY = None


def _roll_convention_is_numpy():
    global _ROLL_IS_NUMPY
    if _ROLL_IS_NUMPY is None:
        def probe(x_ref, o_ref):
            o_ref[...] = pltpu.roll(x_ref[...], shift=1, axis=1)

        x = jnp.tile(jnp.arange(128, dtype=jnp.float32)[None, :], (8, 1))
        y = pl.pallas_call(
            probe, out_shape=jax.ShapeDtypeStruct((8, 128), jnp.float32))(x)
        first = float(y[0, 0])
        assert first in (127.0, 1.0), first
        _ROLL_IS_NUMPY = first == 127.0     # np.roll convention: y[0] = x[-1] = 127
    return _ROLL_IS_NUMPY


# --------------------------------------------------------------------------------------
# In-kernel helpers (all operate on channels-first-flat (C, N) values, N = Bt * H * W).
# --------------------------------------------------------------------------------------
def _shift_lanes(x, d, roll_is_numpy):
    """Returns y with y[:, j] = x[:, (j + d) % n]; unwanted wrap is masked by the caller."""
    n = x.shape[-1]
    s = ((-d) if roll_is_numpy else d) % n
    if s == 0:
        return x
    return pltpu.roll(x, shift=s, axis=1)


def _build_patches(x, W, mask_ref, ones_flags, roll_is_numpy):
    """(9*C, N) patch matrix for a 3x3 / pad-1 conv; masks come from a constant VMEM input."""
    taps = []
    t = 0
    for dy in (-1, 0, 1):
        for dx in (-1, 0, 1):
            d = dy * W + dx
            s = x if d == 0 else _shift_lanes(x, d, roll_is_numpy)
            if not ones_flags[t]:          # skip multiply for all-ones (center) masks
                s = s * mask_ref[t]
            taps.append(s)
            t += 1
    return jnp.concatenate(taps, axis=0)


def _conv_from_patches(patches, w, b, relu):
    """One MXU matmul (8, 72) x (72, N) + folded-BN bias (+ ReLU)."""
    y = jnp.dot(w, patches, preferred_element_type=jnp.float32) + b
    return jnp.maximum(y, 0.0) if relu else y


def _residual(x, blk, W, mask_ref, ones_flags, w_ref, b_ref, roll_is_numpy):
    i1, i2, isk = blk
    # Patch matrix of x is shared by conv_1 and the skip conv (review item #2).
    p_x = _build_patches(x, W, mask_ref, ones_flags, roll_is_numpy)
    t = _conv_from_patches(p_x, w_ref[i1], b_ref[i1], relu=True)
    skip = x if isk < 0 else _conv_from_patches(p_x, w_ref[isk], b_ref[isk], relu=False)
    p_t = _build_patches(t, W, mask_ref, ones_flags, roll_is_numpy)
    mid = _conv_from_patches(p_t, w_ref[i2], b_ref[i2], relu=False)
    return jnp.maximum(mid + skip, 0.0)


def _hourglass_kernel(x_ref, w_ref, b_ref, mhi_ref, mlo_ref, pool_ref, ups_ref, o_ref, *,
                      up_blocks, low_blocks, H, W, bt, ones_hi, ones_lo, roll_is_numpy):
    """Whole HourGlassBlock forward for Bt batch-packed images, entirely on-chip."""
    x = x_ref[0]                                   # (8, Bt*H*W)
    cp = x.shape[0]
    HW = H * W
    h2w2 = (H // 2) * (W // 2)

    # up branch (full resolution, all Bt images packed along the lane axis)
    up1 = x
    for blk in up_blocks:
        up1 = _residual(up1, blk, W, mhi_ref, ones_hi, w_ref, b_ref, roll_is_numpy)

    # 2x2 stride-2 maxpool: two lane-rotated maxes + per-image 0/1 selection matmul.
    m = jnp.maximum(x, _shift_lanes(x, 1, roll_is_numpy))
    m = jnp.maximum(m, _shift_lanes(m, W, roll_is_numpy))
    pool_m = pool_ref[...].astype(jnp.float32)     # (HW, n_lo); exact 0/1 stored as bf16
    n_lo = pool_m.shape[-1]
    low = jnp.zeros((cp, n_lo), jnp.float32)
    for i in range(bt):                            # unrolled, bt is small & static
        piece = jnp.dot(m[:, i * HW:(i + 1) * HW], pool_m,
                        preferred_element_type=jnp.float32)     # image i in lanes [0, h2w2)
        low = low + (piece if i == 0 else _shift_lanes(piece, -i * h2w2, roll_is_numpy))

    # low branch: low_1 -> low_2 -> low_3 at half resolution (packed, lane-dense)
    for blk in low_blocks:
        low = _residual(low, blk, W // 2, mlo_ref, ones_lo, w_ref, b_ref, roll_is_numpy)

    # bilinear x2 upsample (align_corners=True) per image + skip add; 256-lane aligned stores
    ups = ups_ref[...]                             # (n_lo, HW); rows >= h2w2 are zero
    for i in range(bt):
        lsh = low if i == 0 else _shift_lanes(low, i * h2w2, roll_is_numpy)
        up_i = jnp.dot(lsh, ups, preferred_element_type=jnp.float32)
        o_ref[0, :, i * HW:(i + 1) * HW] = up_i + up1[:, i * HW:(i + 1) * HW]


# --------------------------------------------------------------------------------------
# Host-side preparation (one-time): masks, interpolation / pooling matrices, weight packing.
# --------------------------------------------------------------------------------------
def _bilinear_matrix_1d(n_in, n_out):
    """(n_out, n_in) 1D interpolation matrix for bilinear resize, align_corners=True."""
    if n_in == 1:
        return jnp.ones((n_out, 1), jnp.float32)
    if n_out == 1:
        return jnp.eye(1, n_in, dtype=jnp.float32)
    pos = jnp.arange(n_out, dtype=jnp.float32) * (n_in - 1) / (n_out - 1)
    lo = jnp.clip(jnp.floor(pos), 0, n_in - 2).astype(jnp.int32)
    frac = pos - lo.astype(jnp.float32)
    return ((1.0 - frac)[:, None] * jax.nn.one_hot(lo, n_in, dtype=jnp.float32)
            + frac[:, None] * jax.nn.one_hot(lo + 1, n_in, dtype=jnp.float32))


def _upsample_matrix(h2, w2, n_lo):
    """Per-image low (C, h2*w2 lanes) @ M -> (C, 4*h2*w2); rows >= h2*w2 are zero."""
    m = jnp.kron(_bilinear_matrix_1d(h2, 2 * h2),
                 _bilinear_matrix_1d(w2, 2 * w2))               # (4*h2w2, h2w2)
    return jnp.pad(m.T, ((0, n_lo - h2 * w2), (0, 0))).astype(jnp.float32)


def _pool_matrix(H, W, n_lo):
    """0/1 matrix gathering the top-left corner of each 2x2 window (per image), bf16-exact."""
    h2, w2 = H // 2, W // 2
    k = jnp.arange(h2 * w2)
    rows = 2 * (k // w2) * W + 2 * (k % w2)
    m = jnp.zeros((H * W, n_lo), jnp.float32).at[rows, k].set(1.0)
    return m.astype(jnp.bfloat16)


def _make_masks(H, W, n_lanes):
    """(9, 1, n_lanes) f32 tap-validity masks for the batch-packed layout + all-ones flags."""
    lane = jnp.arange(n_lanes, dtype=jnp.int32)
    j = lane % (H * W)                 # within-image flat position (images are contiguous)
    hh = j // W
    ww = j % W
    rows, flags = [], []
    for dy in (-1, 0, 1):
        for dx in (-1, 0, 1):
            valid = ((hh + dy >= 0) & (hh + dy < H) & (ww + dx >= 0) & (ww + dx < W))
            rows.append(valid.astype(jnp.float32))
            flags.append(bool(jnp.all(valid)))
    return jnp.stack(rows)[:, None, :], tuple(flags)


def _build_schedule(params):
    """Flattens the n==1 hourglass into a conv list + residual-block index schedule."""
    convs = []

    def add_res(p):
        i1 = len(convs); convs.append((p["w1"],) + tuple(p["bn1"]))
        i2 = len(convs); convs.append((p["w2"],) + tuple(p["bn2"]))
        if "ws" in p:
            isk = len(convs); convs.append((p["ws"],) + tuple(p["bns"]))
        else:
            isk = -1
        return (i1, i2, isk)

    up_blocks = tuple(add_res(p) for p in params["up_1"])
    low_blocks = tuple(add_res(p) for p in
                       list(params["low_1"]) + list(params["low_2"]) + list(params["low_3"]))
    return convs, up_blocks, low_blocks


def _pack_convs(convs, cp):
    """Folds BN scale into the weights and packs all convs into two uniform buffers."""
    ws, bs = [], []
    for (w, scale, bias) in convs:
        cin, cout = int(w.shape[2]), int(w.shape[3])
        wf = w.reshape(9, cin, cout) * scale[None, None, :]        # fold BN scale
        wf = jnp.transpose(wf, (2, 0, 1))                          # (cout, 9, cin)
        wf = jnp.pad(wf, ((0, cp - cout), (0, 0), (0, cp - cin)))  # -> (8, 9, 8)
        ws.append(wf.reshape(cp, 9 * cp))
        bs.append(jnp.pad(bias, (0, cp - cout)).reshape(cp, 1))
    return (jnp.stack(ws).astype(jnp.float32),                     # (n_conv, 8, 72)
            jnp.stack(bs).astype(jnp.float32))                     # (n_conv, 8, 1)


def make_hourglass_forward(params, H, W, cp=_CP, images_per_step=None):
    """Builds a jitted NCHW forward for HourGlassBlock backed by one fused Pallas kernel."""
    assert params["n"] <= 1
    assert H % 2 == 0 and W % 2 == 0
    HW = H * W
    h2w2 = (H // 2) * (W // 2)
    assert HW % 128 == 0
    # Smallest per-step image count making the half-resolution lane width a multiple of 128.
    bt_min = 128 // math.gcd(128, h2w2)
    bt = images_per_step if images_per_step is not None else bt_min
    assert bt >= 1 and bt % bt_min == 0

    convs, up_blocks, low_blocks = _build_schedule(params)
    assert all(int(w.shape[2]) <= cp and int(w.shape[3]) <= cp for (w, _, _) in convs)
    c0 = int(convs[0][0].shape[2])                                 # channels[0]

    w_all, b_all = _pack_convs(convs, cp)
    nconv = int(w_all.shape[0])
    n_hi = bt * HW                                                 # full-res lanes per step
    n_lo = bt * h2w2                                               # half-res lanes per step
    masks_hi, ones_hi = _make_masks(H, W, n_hi)
    masks_lo, ones_lo = _make_masks(H // 2, W // 2, n_lo)
    pool_mat = _pool_matrix(H, W, n_lo)                            # (HW, n_lo) bf16
    ups_mat = _upsample_matrix(H // 2, W // 2, n_lo)               # (n_lo, HW) f32

    kernel = functools.partial(
        _hourglass_kernel, up_blocks=up_blocks, low_blocks=low_blocks,
        H=H, W=W, bt=bt, ones_hi=ones_hi, ones_lo=ones_lo,
        roll_is_numpy=_roll_convention_is_numpy())

    def forward(x_nchw):
        B, C, Hx, Wx = x_nchw.shape
        assert (C, Hx, Wx) == (c0, H, W)
        gt = -(-B // bt)                   # grid steps; stays >= 2 on v7x once B > bt
        bp = gt * bt
        # NCHW -> (steps, cp, Bt*H*W): channel-pad to 8, pack Bt images along lanes.
        xf = x_nchw.astype(jnp.float32).reshape(B, C, HW)
        xf = jnp.pad(xf, ((0, bp - B), (0, cp - C), (0, 0)))
        xf = xf.reshape(gt, bt, cp, HW).transpose(0, 2, 1, 3).reshape(gt, cp, n_hi)
        out = pl.pallas_call(
            kernel,
            out_shape=jax.ShapeDtypeStruct((gt, cp, n_hi), jnp.float32),
            grid=(gt,),
            in_specs=[
                pl.BlockSpec((1, cp, n_hi), lambda g: (g, 0, 0)),            # packed x
                pl.BlockSpec((nconv, cp, 9 * cp), lambda g: (0, 0, 0)),      # packed weights
                pl.BlockSpec((nconv, cp, 1), lambda g: (0, 0, 0)),           # packed biases
                pl.BlockSpec((9, 1, n_hi), lambda g: (0, 0, 0)),             # hi-res tap masks
                pl.BlockSpec((9, 1, n_lo), lambda g: (0, 0, 0)),             # lo-res tap masks
                pl.BlockSpec((HW, n_lo), lambda g: (0, 0)),                  # pool matrix (bf16)
                pl.BlockSpec((n_lo, HW), lambda g: (0, 0)),                  # upsample matrix
            ],
            out_specs=pl.BlockSpec((1, cp, n_hi), lambda g: (g, 0, 0)),
            compiler_params=pltpu.CompilerParams(
                dimension_semantics=("parallel",)),   # batch-step axis -> both TCs on v7x
        )(xf, w_all, b_all, masks_hi, masks_lo, pool_mat, ups_mat)
        # Unpack lanes -> batch, drop channel/batch padding in XLA (cheap slice).
        out = out.reshape(gt, cp, bt, HW).transpose(0, 2, 1, 3).reshape(bp, cp, H, W)
        return out[:B, :c0]

    return jax.jit(forward)


# --------------------------------------------------------------------------------------
# Deterministic parameter initialization (shapes follow the PyTorch module __init__)
# --------------------------------------------------------------------------------------
def _init_conv(key, cin, cout):
    return (jax.random.normal(key, (3, 3, cin, cout), jnp.float32)
            / jnp.sqrt(9.0 * cin)).astype(jnp.float32)


def _init_bn(key, c):
    k1, k2, k3, k4 = jax.random.split(key, 4)
    gamma = 1.0 + 0.1 * jax.random.normal(k1, (c,), jnp.float32)
    beta = 0.1 * jax.random.normal(k2, (c,), jnp.float32)
    mean = 0.1 * jax.random.normal(k3, (c,), jnp.float32)
    var = 0.5 + jax.nn.softplus(jax.random.normal(k4, (c,), jnp.float32))
    scale = gamma / jnp.sqrt(var + _EPS)
    bias = beta - mean * scale
    return scale, bias


def _init_residual(key, cin, cout):
    ks = jax.random.split(key, 6)
    p = {"w1": _init_conv(ks[0], cin, cout), "bn1": _init_bn(ks[1], cout),
         "w2": _init_conv(ks[2], cout, cout), "bn2": _init_bn(ks[3], cout)}
    if cin != cout:  # stride is always 1 inside HourGlassBlock
        p["ws"] = _init_conv(ks[4], cin, cout)
        p["bns"] = _init_bn(ks[5], cout)
    return p


def _init_layer(key, cin, cout, nb):
    ks = jax.random.split(key, nb)
    ps = [_init_residual(ks[0], cin, cout)]
    for i in range(1, nb):
        ps.append(_init_residual(ks[i], cout, cout))
    return ps


def _init_layer_revr(key, cin, cout, nb):
    ks = jax.random.split(key, nb)
    ps = [_init_residual(ks[i], cin, cin) for i in range(nb - 1)]
    ps.append(_init_residual(ks[nb - 1], cin, cout))
    return ps


def init_hourglass(key, n, channels, blocks):
    ks = jax.random.split(key, 4)
    p = {"n": n,
         "up_1": _init_layer(ks[0], channels[0], channels[0], blocks[0]),
         "low_1": _init_layer(ks[1], channels[0], channels[1], blocks[0]),
         "low_3": _init_layer_revr(ks[3], channels[1], channels[0], blocks[0])}
    if n <= 1:
        p["low_2"] = _init_layer(ks[2], channels[1], channels[1], blocks[1])
    else:
        p["low_2"] = init_hourglass(ks[2], n - 1, channels[1:], blocks[1:])
    return p


# --------------------------------------------------------------------------------------
# Pure-JAX reference (NHWC) for the correctness check
# --------------------------------------------------------------------------------------
def _ref_conv_bn(x, w, scale, bias, relu):
    y = jax.lax.conv_general_dilated(
        x, w, window_strides=(1, 1), padding="SAME",
        dimension_numbers=("NHWC", "HWIO", "NHWC"),
        precision=jax.lax.Precision.HIGHEST)
    y = y * scale[None, None, None, :] + bias[None, None, None, :]
    return jnp.maximum(y, 0.0) if relu else y


def _ref_residual(x, p):
    s1, b1 = p["bn1"]
    s2, b2 = p["bn2"]
    t = _ref_conv_bn(x, p["w1"], s1, b1, True)
    b = _ref_conv_bn(t, p["w2"], s2, b2, False)
    skip = _ref_conv_bn(x, p["ws"], *p["bns"], False) if "ws" in p else x
    return jnp.maximum(b + skip, 0.0)


def _ref_maxpool(x):
    B, H, W, C = x.shape
    return x.reshape(B, H // 2, 2, W // 2, 2, C).max(axis=(2, 4))


def _ref_upsample(x):
    B, H, W, C = x.shape
    Ho, Wo = 2 * H, 2 * W
    py = jnp.arange(Ho, dtype=jnp.float32) * (H - 1) / (Ho - 1)
    px = jnp.arange(Wo, dtype=jnp.float32) * (W - 1) / (Wo - 1)
    y0 = jnp.clip(jnp.floor(py), 0, H - 2).astype(jnp.int32)
    x0 = jnp.clip(jnp.floor(px), 0, W - 2).astype(jnp.int32)
    fy = (py - y0)[None, :, None, None]
    fx = (px - x0)[None, None, :, None]
    g00 = x[:, y0][:, :, x0]
    g01 = x[:, y0][:, :, x0 + 1]
    g10 = x[:, y0 + 1][:, :, x0]
    g11 = x[:, y0 + 1][:, :, x0 + 1]
    return (g00 * (1 - fy) * (1 - fx) + g01 * (1 - fy) * fx
            + g10 * fy * (1 - fx) + g11 * fy * fx)


def _ref_hourglass(x, params):
    up1 = x
    for p in params["up_1"]:
        up1 = _ref_residual(up1, p)
    low = _ref_maxpool(x)
    for p in params["low_1"]:
        low = _ref_residual(low, p)
    if params["n"] <= 1:
        for p in params["low_2"]:
            low = _ref_residual(low, p)
    else:
        low = _ref_hourglass(low, params["low_2"])
    for p in params["low_3"]:
        low = _ref_residual(low, p)
    return _ref_upsample(low) + up1


# --------------------------------------------------------------------------------------
if __name__ == "__main__":
    key = jax.random.PRNGKey(0)
    k_x, k_p = jax.random.split(key)

    # HourGlassBlock(n=1, channels=[4, 8], blocks=[1, 1]); PyTorch-style NCHW input.
    B, C0, H, W = 2, 4, 16, 16
    x_nchw = jax.random.normal(k_x, (B, C0, H, W), jnp.float32)
    params = init_hourglass(k_p, n=1, channels=(4, 8), blocks=(1, 1))

    fwd = make_hourglass_forward(params, H=H, W=W)
    out = jax.block_until_ready(fwd(x_nchw))
    assert out.shape == (B, C0, H, W), out.shape

    # Reference in NHWC, compared in NCHW (all-f32 pipeline, 1e-3 tolerance).
    x_nhwc = jnp.transpose(x_nchw, (0, 2, 3, 1))
    ref = jnp.transpose(_ref_hourglass(x_nhwc, params), (0, 3, 1, 2))
    max_err = float(jnp.max(jnp.abs(out - ref)))
    assert jnp.allclose(out, ref, rtol=1e-3, atol=1e-3), max_err

    print("KERNEL_OK")
</pallas_src>

<mosaic_0001>
module attributes {stable_mosaic.version = 11 : i64} {
  func.func @probe(%arg0: memref<8x128xf32, #tpu.memory_space<vmem>>, %arg1: memref<8x128xf32, #tpu.memory_space<vmem>>) attributes {dimension_semantics = [], scalar_prefetch = 0 : i64, scratch_operands = 0 : i64, tpu.core_type = #tpu.core_type<tc>} {
    %c0 = arith.constant 0 : index
    %c0_0 = arith.constant 0 : index
    %0 = vector.load %arg0[%c0, %c0_0] : memref<8x128xf32, #tpu.memory_space<vmem>>, vector<8x128xf32>
    %c1_i32 = arith.constant 1 : i32
    %1 = tpu.dynamic_rotate %0 by %c1_i32 dim 1 : vector<8x128xf32>, i32 -> vector<8x128xf32>
    %c0_1 = arith.constant 0 : index
    %c0_2 = arith.constant 0 : index
    %2 = vector.load %arg1[%c0_1, %c0_2] : memref<8x128xf32, #tpu.memory_space<vmem>>, vector<8x128xf32>
    tpu.vector_store %arg1[%c0_1, %c0_2], %1 {strides = array<i32>} : memref<8x128xf32, #tpu.memory_space<vmem>>, vector<8x128xf32>,
    return
  }
}

</mosaic_0001>

<bundles_post_ra>
// kernel: tpu_custom_call.1
= control target key start
LH: loop header
LB: loop body
LE: loop exit
PB: predicated region body
PF: predicated region fallthrough
CT: control target
= control target key end

     0   :  { %6 = vsyncpa [#allocation3], 0  ;;  %s128_s0 = inlined_call_operand.hbm [shape: f32[8,128], index: 0, kind: input, shape index: {}]   ;;  %s129_s1 = inlined_call_operand.hbm [shape: f32[8,128], index: 1, kind: output, shape index: {}]  }
   0x1   :  { %7 = vsyncpa [#allocation4], 0  ;;  %s91_s6 = smov [#allocation2]   ;;  %s43_s10 = scalar_lea.hbm %s128_s0, 128 }
   0x2   :  { %s14_s7 = sshll.u32 %s91_s6, 4  ;;  %p44_p0 = scmp.ne.s32.totalorder %s128_s0, %s43_s10  ;;  %s15_s7 = int_to_ptr.vmem [resolvable:$true] %s14_s7 }
   0x3   :  { %p47_p1 = scmp.lt.u32.totalorder %s43_s10, %s128_s0 }
   0x5   :  { %p49_p2 = pnand %p47_p1, %p44_p0 }
   0x7   :  { %52 = shalt.err (!%p49_p2)
}
   0x8   :  { %s53_s15 = scalar_lea.vmem %s15_s7, 128  ;;  %p58_p4 = scmp.lt.s32.totalorder %s15_s7, %s15_s7 }
   0x9   :  { %p54_p3 = scmp.ne.s32.totalorder %s15_s7, %s53_s15  ;;  %p59_p5 = scmp.lt.s32.totalorder %s53_s15, %s53_s15 }
   0xb   :  { %p60_p6 = por %p59_p5, %p58_p4 }
   0xd   :  { %p61_p7 = pnand %p60_p6, %p54_p3 }
   0xf   :  { %64 = shalt.err (!%p61_p7)
}
  0x10   :  { %17 = dma.hbm_to_vmem [thread:$0]  %s128_s0, 128, %s15_s7, [#allocation3]  }
  0x11   :  { %87 = dma.done.wait [#allocation3], 128  }
  0x12   :  { %88 = vsyncadd [#allocation3], 4294967168  ;;  %v21_v0 = vld [vmem:[#allocation2] sm:$0xff]  ;;  %s92_s18 = smov 1   ;;  %s93_s19 = smov [#allocation5]  }
  0x13   :  { %22 = vrot.lane.b32.xlu0 %v21_v0, %s92_s18  ;;  %s31_s20 = sshll.u32 %s93_s19, 4  ;;  %s32_s20 = int_to_ptr.vmem [resolvable:$true] %s31_s20 }
  0x14   :  { %s65_s21 = scalar_lea.vmem %s32_s20, 128  ;;  %p70_p9 = scmp.lt.s32.totalorder %s32_s20, %s32_s20 }
  0x15   :  { %p66_p8 = scmp.ne.s32.totalorder %s32_s20, %s65_s21  ;;  %p71_p10 = scmp.lt.s32.totalorder %s65_s21, %s65_s21 }
  0x17   :  { %p72_p11 = por %p71_p10, %p70_p9 }
  0x19   :  { %p73_p12 = pnand %p72_p11, %p66_p8 }
  0x85   :  { %v23_v1 = vpop.permute.xlu0 %22 }
  0x86   :  { %24 = vst [vmem:[#allocation5] sm:$0xff] %v23_v1 }
  0x87   :  { %76 = shalt.err (!%p73_p12)
}
  0x88   :  { %s77_s0 = scalar_lea.hbm %s129_s1, 128 }
  0x89   :  { %p78_p13 = scmp.ne.s32.totalorder %s129_s1, %s77_s0  ;;  %p81_p0 = scmp.lt.u32.totalorder %s77_s0, %s129_s1 }
  0x8b   :  { %p83_p1 = pnand %p81_p0, %p78_p13 }
  0x8d   :  { %86 = shalt.err (!%p83_p1)
}
  0x8e   :  { %34 = dma.vmem_to_hbm [thread:$0]  %s32_s20, 128, %s129_s1, [#allocation4]  }
  0x8f   :  { %89 = dma.done.wait [#allocation4], 128  }
  0x90   :  { %90 = vsyncadd [#allocation4], 4294967168 }
  0x91   :  { %38 = vsyncpa [#allocation3], 1 }
  0x92   :  { %39 = vsyncpa [#allocation4], 1 }

</bundles_post_ra>
